<compile_context>
chip_gen: v7x
topology: tpu7x:2x2x1
jax: 0.10.0
libtpu: 0.0.40
codegen_flags: <defaults>
</compile_context>

<pallas_src>
import math
from functools import partial

import jax
import jax.numpy as jnp
from jax.experimental import pallas as pl
from jax.experimental.pallas import tpu as pltpu

_LANE = 128


# --------------------------------------------------------------------------- #
# Kernels
# --------------------------------------------------------------------------- #
def _ml_kernel_direct(x_ref, w_ref, b_ref, o_ref):
    # Single-K-tile path: write the output directly (no accumulator scratch).
    # x_ref: (TM, TK)  w_ref: (1, TK, TN)  b_ref: (1, 1, TN)  o_ref: (TM, TN)
    acc = jnp.dot(x_ref[...], w_ref[0], preferred_element_type=jnp.float32)
    o_ref[...] = (acc + b_ref[0].astype(jnp.float32)).astype(o_ref.dtype)


def _ml_kernel_acc(x_ref, w_ref, b_ref, o_ref, acc_ref):
    # Multi-K-tile fallback: f32 accumulator with pl.when init / finalize.
    k = pl.program_id(3)

    @pl.when(k == 0)
    def _init():
        acc_ref[...] = jnp.zeros_like(acc_ref)

    acc_ref[...] += jnp.dot(x_ref[...], w_ref[0],
                            preferred_element_type=jnp.float32)

    @pl.when(k == pl.num_programs(3) - 1)
    def _finalize():
        o_ref[...] = (acc_ref[...] + b_ref[0].astype(jnp.float32)
                      ).astype(o_ref.dtype)


# --------------------------------------------------------------------------- #
# Tiling helpers
# --------------------------------------------------------------------------- #
def _min_group(f, o):
    """Smallest g such that g*f and g*o are both multiples of 128."""
    gf = _LANE // math.gcd(_LANE, f)
    go = _LANE // math.gcd(_LANE, o)
    return gf * go // math.gcd(gf, go)


def _largest_aligned_divisor(dim, cap, align=_LANE):
    """Largest divisor of `dim` that is a multiple of `align` and <= cap.
    `dim` must itself be a multiple of `align`."""
    if dim <= cap:
        return dim
    best = align
    d = align
    while d <= cap:
        if dim % d == 0:
            best = d
        d += align
    return best


def _vmem_budget_and_cap():
    """(tile-selection budget, vmem_limit clamp) per TPU generation."""
    phys = 0
    try:
        phys = int(getattr(pltpu.get_tpu_info(), "vmem_capacity_bytes", 0) or 0)
    except Exception:
        phys = 0
    if phys == 0:
        try:
            kind = jax.devices()[0].device_kind.lower()
            phys = 64 * 2**20 if ("v7" in kind or "7x" in kind) else 128 * 2**20
        except Exception:
            phys = 64 * 2**20              # conservative (v7x-sized) default
    if phys >= 128 * 2**20:                # v5e / v6e: 128 MiB per TensorCore
        return 56 * 2**20, 96 * 2**20
    return 26 * 2**20, 44 * 2**20          # v7x: 64 MiB per TensorCore


def _footprint(tm, tk, tn, k_tiles, x_bytes, w_bytes, b_bytes, o_bytes):
    fp = (2 * tm * tk * x_bytes            # x tile, double buffered
          + 2 * tm * tn * o_bytes          # out tile, double buffered
          + 2 * tk * tn * w_bytes          # weight tile, double buffered
          + 2 * tn * b_bytes)              # bias tile, double buffered
    if k_tiles > 1:
        fp += tm * tn * 4                  # f32 accumulator scratch
    return fp


def _choose_tiles(m, gf, go_full, x_bytes, w_bytes, b_bytes, o_bytes, budget):
    # N tile: full g*o when small, otherwise a <=1024-lane divisor.
    tn = go_full if go_full <= 1024 else _largest_aligned_divisor(go_full, 1024)

    # K tile: keep the whole reduction in one tile (weight resident across the
    # M sweep, direct-write kernel) whenever its double buffer fits ~1/3 of
    # the budget; otherwise the largest 128-multiple divisor that does.
    w_cap = max(budget // 3, 2 * _LANE * tn * w_bytes)
    if 2 * gf * tn * w_bytes <= w_cap:
        tk = gf
    else:
        tk_cap = max(_LANE, (w_cap // (2 * tn * w_bytes)) // _LANE * _LANE)
        tk = _largest_aligned_divisor(gf, tk_cap)
    k_tiles = gf // tk

    # M tile: start large and shrink to fit the budget; dtype-aware floor.
    min_tm = 8 * max(1, 4 // x_bytes)      # f32 -> 8, bf16 -> 16, int8 -> 32
    tm = 4096
    while tm > min_tm and _footprint(tm, tk, tn, k_tiles, x_bytes, w_bytes,
                                     b_bytes, o_bytes) > budget:
        tm //= 2
    tm = max(tm, min_tm)
    if m <= tm:
        tm = m                             # full-extent block is always legal
    return tm, tk, tn


# --------------------------------------------------------------------------- #
# Parameter packing (do once; treat as the stored parameter layout)
# --------------------------------------------------------------------------- #
def pack_multi_linear_params(weight, bias=None):
    """Pack (W, b) into the kernel's block-diagonal grouped layout.

    Returns (w_bd, b_pk, g):
      w_bd: (n_groups, g*in_channels, g*out_channels) block-diagonal weights
      b_pk: (n_groups, 1, g*out_channels) biases
    """
    n, f, o = weight.shape
    g = _min_group(f, o)
    ng = -(-n // g)
    n_pad = ng * g

    w_in = weight
    b_in = bias if bias is not None else jnp.zeros((n, o), dtype=weight.dtype)
    if n_pad != n:
        w_in = jnp.pad(w_in, ((0, n_pad - n), (0, 0), (0, 0)))
        b_in = jnp.pad(b_in, ((0, n_pad - n), (0, 0)))

    if g == 1:
        w_bd = w_in
    else:
        # Scatter per-instance weights onto the block diagonal (avoids the
        # g^2-sized broadcast-multiply intermediate of an eye()-based pack).
        w4 = w_in.reshape(ng, g, f, o)
        idx = jnp.arange(g)
        w5 = jnp.zeros((ng, g, f, g, o), dtype=w_in.dtype)
        w5 = w5.at[:, idx, :, idx, :].set(jnp.transpose(w4, (1, 0, 2, 3)))
        w_bd = w5.reshape(ng, g * f, g * o)
    b_pk = b_in.reshape(ng, 1, g * o)
    return w_bd, b_pk, g


# --------------------------------------------------------------------------- #
# Forward
# --------------------------------------------------------------------------- #
@partial(jax.jit, static_argnames=("g", "out_channels"))
def multi_linear_packed(x, w_bd, b_pk, *, g, out_channels):
    """x: [b, t, n, f]; packed params from pack_multi_linear_params."""
    b, t, n, f = x.shape
    o = out_channels
    ng, gf, go_full = w_bd.shape
    assert gf == g * f and go_full == g * o
    n_pad = ng * g
    M = b * t

    # TODO(synk): optional bf16 cast of x2/w_bd (keeping preferred_element_type
    # f32) would ~halve HBM traffic in the memory-bound small-f/o regime.
    x2 = x.reshape(M, n, f)
    if n_pad != n:
        x2 = jnp.pad(x2, ((0, 0), (0, n_pad - n), (0, 0)))
    x2 = x2.reshape(M, n_pad * f)          # pure reshape, no HBM transpose

    budget, limit_cap = _vmem_budget_and_cap()
    xb = x.dtype.itemsize
    wb = w_bd.dtype.itemsize
    bb = b_pk.dtype.itemsize
    tm, tk, tn = _choose_tiles(M, gf, go_full, xb, wb, bb, xb, budget)

    m_tiles = -(-M // tm)
    k_tiles = gf // tk
    n_tiles = go_full // tn
    kpg = k_tiles                          # K-block stride of one group in x2
    npg = n_tiles                          # N-block stride of one group in out

    fp = _footprint(tm, tk, tn, k_tiles, xb, wb, bb, xb)
    vmem_limit = int(min(limit_cap, max(fp + 8 * 2**20, 32 * 2**20)))

    kernel = _ml_kernel_direct if k_tiles == 1 else _ml_kernel_acc
    scratch = [] if k_tiles == 1 else [pltpu.VMEM((tm, tn), jnp.float32)]

    out2 = pl.pallas_call(
        kernel,
        out_shape=jax.ShapeDtypeStruct((M, n_pad * o), x.dtype),
        grid_spec=pltpu.PrefetchScalarGridSpec(
            num_scalar_prefetch=0,
            grid=(ng, m_tiles, n_tiles, k_tiles),
            in_specs=[
                pl.BlockSpec((tm, tk), lambda i, m, nb, k: (m, i * kpg + k)),
                pl.BlockSpec((1, tk, tn), lambda i, m, nb, k: (i, k, nb)),
                pl.BlockSpec((1, 1, tn), lambda i, m, nb, k: (i, 0, nb)),
            ],
            out_specs=pl.BlockSpec((tm, tn),
                                   lambda i, m, nb, k: (m, i * npg + nb)),
            scratch_shapes=scratch,
        ),
        compiler_params=pltpu.CompilerParams(
            dimension_semantics=("parallel", "parallel", "parallel",
                                 "arbitrary"),
            vmem_limit_bytes=vmem_limit,
        ),
    )(x2, w_bd, b_pk)

    out = out2.reshape(M, n_pad, o)
    if n_pad != n:
        out = out[:, :n, :]
    return out.reshape(b, t, n, o)


def multi_linear(x, weight, bias=None):
    """Convenience wrapper: packs parameters on every call. For repeated
    forwards, call pack_multi_linear_params once and use multi_linear_packed."""
    _, _, o = weight.shape
    w_bd, b_pk, g = pack_multi_linear_params(weight, bias)
    return multi_linear_packed(x, w_bd, b_pk, g=g, out_channels=o)


if __name__ == "__main__":
    # Small shapes consistent with the module's usage: input [b, t, n, f].
    batch, time_steps, n_instances = 2, 8, 4
    in_channels, out_channels = 32, 32

    key = jax.random.PRNGKey(0)
    kx, kw, kb = jax.random.split(key, 3)

    # Parameter init matching reset_parameters(): U(-1/sqrt(in), 1/sqrt(in)).
    bound = 1.0 / math.sqrt(in_channels)
    weight = jax.random.uniform(
        kw, (n_instances, in_channels, out_channels),
        minval=-bound, maxval=bound, dtype=jnp.float32)
    bias = jax.random.uniform(
        kb, (n_instances, out_channels),
        minval=-bound, maxval=bound, dtype=jnp.float32)

    x = jax.random.normal(
        kx, (batch, time_steps, n_instances, in_channels), dtype=jnp.float32)

    # Pack once (stored-parameter layout), then run the kernel.
    w_bd, b_pk, g = pack_multi_linear_params(weight, bias)
    y = multi_linear_packed(x, w_bd, b_pk, g=g, out_channels=out_channels)
    y = jax.block_until_ready(y)

    # Cross-check against the einsum reference (same math as PyTorch forward).
    y_ref = jnp.einsum("...xy,xyz->...xz", x, weight) + bias
    assert y.shape == (batch, time_steps, n_instances, out_channels)
    assert jnp.allclose(y, y_ref, atol=2e-5, rtol=2e-5)

    print("KERNEL_OK")
</pallas_src>

<mosaic_0001>
module attributes {stable_mosaic.version = 11 : i64} {
  func.func @_ml_kernel_direct(%arg0: i32, %arg1: i32, %arg2: i32, %arg3: i32, %arg4: memref<16x128xf32, #tpu.memory_space<vmem>>, %arg5: memref<1x128x128xf32, #tpu.memory_space<vmem>>, %arg6: memref<1x1x128xf32, #tpu.memory_space<vmem>>, %arg7: memref<16x128xf32, #tpu.memory_space<vmem>>) attributes {dimension_semantics = [#tpu.dimension_semantics<parallel>, #tpu.dimension_semantics<parallel>, #tpu.dimension_semantics<parallel>, #tpu.dimension_semantics<arbitrary>], iteration_bounds = array<i64: 1, 1, 1, 1>, scalar_prefetch = 0 : i64, scratch_operands = 0 : i64, tpu.core_type = #tpu.core_type<tc>, window_params = [{transform_indices = @transform_0, window_bounds = array<i64: 16, 128>}, {transform_indices = @transform_1, window_bounds = array<i64: 1, 128, 128>}, {transform_indices = @transform_2, window_bounds = array<i64: 1, 1, 128>}, {transform_indices = @transform_3, window_bounds = array<i64: 16, 128>}]} {
    %c0 = arith.constant 0 : index
    %c0_0 = arith.constant 0 : index
    %0 = vector.load %arg4[%c0, %c0_0] : memref<16x128xf32, #tpu.memory_space<vmem>>, vector<16x128xf32>
    %c0_1 = arith.constant 0 : index
    %c0_2 = arith.constant 0 : index
    %c0_3 = arith.constant 0 : index
    %1 = vector.load %arg5[%c0_1, %c0_2, %c0_3] : memref<1x128x128xf32, #tpu.memory_space<vmem>>, vector<1x128x128xf32>
    %2 = vector.shape_cast %1 : vector<1x128x128xf32> to vector<128x128xf32>
    %cst = arith.constant dense<0.000000e+00> : vector<16x128xf32>
    %3 = tpu.matmul %0, %2, %cst {dimension_numbers = #tpu.dot_dimension_numbers<[1], [0], [0], [1], [0, 0, 1, 1], [], []>} : vector<16x128xf32>, vector<128x128xf32>, vector<16x128xf32> -> vector<16x128xf32>
    %c0_4 = arith.constant 0 : index
    %c0_5 = arith.constant 0 : index
    %c0_6 = arith.constant 0 : index
    %4 = vector.load %arg6[%c0_4, %c0_5, %c0_6] : memref<1x1x128xf32, #tpu.memory_space<vmem>>, vector<1x1x128xf32>
    %5 = vector.shape_cast %4 : vector<1x1x128xf32> to vector<1x128xf32>
    %6 = vector.broadcast %5 : vector<1x128xf32> to vector<16x128xf32>
    %7 = arith.addf %3, %6 : vector<16x128xf32>
    %c0_7 = arith.constant 0 : index
    %c0_8 = arith.constant 0 : index
    %8 = vector.load %arg7[%c0_7, %c0_8] : memref<16x128xf32, #tpu.memory_space<vmem>>, vector<16x128xf32>
    tpu.vector_store %arg7[%c0_7, %c0_8], %7 {strides = array<i32>} : memref<16x128xf32, #tpu.memory_space<vmem>>, vector<16x128xf32>,
    return
  }
  func.func @transform_0(%arg0: i32, %arg1: i32, %arg2: i32, %arg3: i32) -> (i32, i32) {
    %c1_i32 = arith.constant 1 : i32
    %0 = arith.muli %arg0, %c1_i32 : i32
    %1 = arith.addi %0, %arg3 : i32
    %c0_i32 = arith.constant 0 : i32
    return %arg1, %1 : i32, i32
  }
  func.func @transform_1(%arg0: i32, %arg1: i32, %arg2: i32, %arg3: i32) -> (i32, i32, i32) {
    %c0_i32 = arith.constant 0 : i32
    return %arg0, %arg3, %arg2 : i32, i32, i32
  }
  func.func @transform_2(%arg0: i32, %arg1: i32, %arg2: i32, %arg3: i32) -> (i32, i32, i32) {
    %c0_i32 = arith.constant 0 : i32
    %c0_i32_0 = arith.constant 0 : i32
    return %arg0, %c0_i32, %arg2 : i32, i32, i32
  }
  func.func @transform_3(%arg0: i32, %arg1: i32, %arg2: i32, %arg3: i32) -> (i32, i32) {
    %c1_i32 = arith.constant 1 : i32
    %0 = arith.muli %arg0, %c1_i32 : i32
    %1 = arith.addi %0, %arg2 : i32
    %c0_i32 = arith.constant 0 : i32
    return %arg1, %1 : i32, i32
  }
}

</mosaic_0001>

<bundles_post_ra>
// kernel: multi_linear_packed.1
= control target key start
LH: loop header
LB: loop body
LE: loop exit
PB: predicated region body
PF: predicated region fallthrough
CT: control target
= control target key end

     0   :  { %8 = vsyncpa [#allocation3], 0  ;;  %s301_s12 = smov [#allocation2]   ;;  %s351_s0 = inlined_call_operand.vmem [shape: f32[16,128], index: 0, kind: input, shape index: {}]   ;;  %s352_s1 = inlined_call_operand.hbm [shape: f32[1,128,128], index: 1, kind: input, shape index: {}]   ;;  %s353_s2 = inlined_call_operand.vmem [shape: f32[1,1,128], index: 2, kind: input, shape index: {}]   ;;  %s354_s3 = inlined_call_operand.vmem [shape: f32[16,128], index: 3, kind: output, shape index: {}]  }
   0x1   :  { %s22_s13 = sshll.u32 %s301_s12, 4  ;;  %s277_s16 = scalar_lea.hbm %s352_s1, 2048  ;;  %s23_s13 = int_to_ptr.vmem [resolvable:$true] %s22_s13 }
   0x2   :  { %p278_p0 = scmp.ne.s32.totalorder %s352_s1, %s277_s16  ;;  %p281_p1 = scmp.lt.u32.totalorder %s277_s16, %s352_s1 }
   0x4   :  { %p283_p2 = pnand %p281_p1, %p278_p0 }
   0x6   :  { %286 = shalt.err (!%p283_p2)
}
   0x7   :  { %s287_s21 = scalar_lea.vmem %s23_s13, 2048  ;;  %p292_p4 = scmp.lt.s32.totalorder %s23_s13, %s23_s13 }
   0x8   :  { %p288_p3 = scmp.ne.s32.totalorder %s23_s13, %s287_s21  ;;  %p293_p5 = scmp.lt.s32.totalorder %s287_s21, %s287_s21 }
   0xa   :  { %p294_p6 = por %p293_p5, %p292_p4 }
   0xc   :  { %p295_p7 = pnand %p294_p6, %p288_p3 }
   0xe   :  { %298 = shalt.err (!%p295_p7)
}
   0xf   :  { %s302_s22 = smov 128   ;;  %s303_s23 = smov 8  }
  0x10   :  { %28 = dma.hbm_to_vmem [thread:$0]  %s352_s1, 2048, %s23_s13, [#allocation3], %s302_s22, %s302_s22, %s303_s23  }
  0x11   :  { %299 = dma.done.wait [#allocation3], 2048  }
  0x12   :  { %300 = vsyncadd [#allocation3], 4294965248  ;;  %v58_v0 = vld [vmem:[#allocation2] sm:$0xff]  ;;  %v59_v1 = vld [vmem:[#allocation2 + $0x8] sm:$0xff] }
  0x13   :  { %v60_v2 = vld [vmem:[#allocation2 + $0x10] sm:$0xff]  ;;  %v242_v3 = vpack.c.bf16 %v59_v1, %v58_v0  ;;  %v61_v4 = vld [vmem:[#allocation2 + $0x18] sm:$0xff]  ;;  %v62_v6 = vld [vmem:[#allocation2 + $0x20] sm:$0xff] }
  0x14   :  { %v246_v5 = vpack.c.bf16 %v61_v4, %v60_v2  ;;  %v63_v7 = vld [vmem:[#allocation2 + $0x28] sm:$0xff]  ;;  %v56_v9 = vld [vmem:[%s351_s0] sm:$0xff]  ;;  %v64_v10 = vld [vmem:[#allocation2 + $0x30] sm:$0xff] }
  0x15   :  { %243 = vmatprep.subr.bf16.mxu0 %v242_v3  ;;  %v250_v8 = vpack.c.bf16 %v63_v7, %v62_v6  ;;  %v65_v11 = vld [vmem:[#allocation2 + $0x38] sm:$0xff]  ;;  %239 = vmatprep.mubr.f32.mxu0 %v56_v9  ;;  %v66_v13 = vld [vmem:[#allocation2 + $0x40] sm:$0xff]  ;;  %v67_v14 = vld [vmem:[#allocation2 + $0x48] sm:$0xff] }
  0x16   :  { %245 = vmatpush3.bf16.msra.mxu0 %v242_v3  ;;  %v254_v12 = vpack.c.bf16 %v65_v11, %v64_v10  ;;  %v258_v15 = vpack.c.bf16 %v67_v14, %v66_v13  ;;  %v68_v16 = vld [vmem:[#allocation2 + $0x50] sm:$0xff]  ;;  %v69_v17 = vld [vmem:[#allocation2 + $0x58] sm:$0xff]  ;;  %v70_v19 = vld [vmem:[#allocation2 + $0x60] sm:$0xff] }
  0x17   :  { %247 = vmatprep.subr.bf16.mxu0 %v246_v5  ;;  %v262_v18 = vpack.c.bf16 %v69_v17, %v68_v16  ;;  %v71_v20 = vld [vmem:[#allocation2 + $0x68] sm:$0xff]  ;;  %v72_v22 = vld [vmem:[#allocation2 + $0x70] sm:$0xff]  ;;  %v73_v23 = vld [vmem:[#allocation2 + $0x78] sm:$0xff] }
  0x18   :  { %v266_v21 = vpack.c.bf16 %v71_v20, %v70_v19  ;;  %v270_v24 = vpack.c.bf16 %v73_v23, %v72_v22  ;;  %v57_v25 = vld [vmem:[%s351_s0 + $0x8] sm:$0xff]  ;;  %v188_v26 = vld [vmem:[%s353_s2] ss:$0 sm:$0xff] }
  0x1a   :  { %249 = vmatpush3.bf16.msra.mxu0 %v246_v5 }
  0x1b   :  { %251 = vmatprep.subr.bf16.mxu0 %v250_v8 }
  0x1e   :  { %253 = vmatpush3.bf16.msra.mxu0 %v250_v8 }
  0x1f   :  { %255 = vmatprep.subr.bf16.mxu0 %v254_v12 }
  0x22   :  { %257 = vmatpush3.bf16.msra.mxu0 %v254_v12 }
  0x23   :  { %259 = vmatprep.subr.bf16.mxu0 %v258_v15 }
  0x26   :  { %261 = vmatpush3.bf16.msra.mxu0 %v258_v15 }
  0x27   :  { %263 = vmatprep.subr.bf16.mxu0 %v262_v18 }
  0x2a   :  { %265 = vmatpush3.bf16.msra.mxu0 %v262_v18 }
  0x2b   :  { %267 = vmatprep.subr.bf16.mxu0 %v266_v21 }
  0x2e   :  { %269 = vmatpush3.bf16.msra.mxu0 %v266_v21 }
  0x2f   :  { %271 = vmatprep.subr.bf16.mxu0 %v270_v24 }
  0x32   :  { %273 = vmatpush3.bf16.msra.mxu0 %v270_v24 }
  0x35   :  { %240 = vmatmul.mubr.f32.vlgmr.msra.gmra.mrb[0].mxu0 %v57_v25 }
 0x108   :  { %v241_v27 = vpop.f32.mrb[0].mxu0 }
 0x109   :  { %v153_v28 = vadd.f32 %v241_v27, %v188_v26  ;;  %v147_v29 = vpop.f32.mrb[1].mxu0 }
 0x10a   :  { %v148_v30 = vadd.f32 %v188_v26, %v147_v29 }
 0x10b   :  { %157 = vst [vmem:[%s354_s3 + $0x8] sm:$0xff] %v153_v28 }
 0x10c   :  { %156 = vst [vmem:[%s354_s3] sm:$0xff] %v148_v30 }
 0x10d   :  { %173 = vsyncpa [#allocation3], 1 }

</bundles_post_ra>
